<compile_context>
chip_gen: v6e
topology: v6e:2x2x1
jax: 0.10.0
libtpu: 0.0.40
codegen_flags: <defaults>
</compile_context>

<pallas_src>
import functools

import jax
import jax.numpy as jnp
from jax.experimental import pallas as pl
from jax.experimental.pallas import tpu as pltpu

LANE = 128


def _round_up(x, m):
    return (x + m - 1) // m * m


def _pick_vocab_tile(V, v_tile):
    """Largest multiple of LANE <= v_tile, preferring exact divisors of V."""
    max_vt = max(LANE, (min(v_tile, _round_up(V, LANE)) // LANE) * LANE)
    if V % LANE == 0:
        for cand in range(max_vt, LANE - 1, -LANE):
            if V % cand == 0:
                return cand
    return max_vt


def ffnn_bow_kernel(x_ref, w1_ref, b1_ref, w2_ref, b2_ref, o_ref, acc_ref, *,
                    num_classes):
    k = pl.program_id(1)

    @pl.when(k == 0)
    def _init():
        acc_ref[...] = jnp.zeros_like(acc_ref)

    # Partial hidden pre-activation for this V tile.  Operands arrive already
    # in the streaming dtype (bf16 by default) -> no in-kernel cast; f32 acc.
    acc_ref[...] += jnp.dot(x_ref[...], w1_ref[...],
                            preferred_element_type=jnp.float32)

    # Finalize once per batch tile: tanh, second matmul, masked log_softmax.
    @pl.when(k == pl.num_programs(1) - 1)
    def _finalize():
        h = jnp.tanh(acc_ref[...] + b1_ref[...])
        logits = jnp.dot(h, w2_ref[...], preferred_element_type=jnp.float32)
        logits = logits + b2_ref[...]
        # Mask padded class lanes so max/logsumexp over the lane axis is exact.
        lane = jax.lax.broadcasted_iota(jnp.int32, logits.shape, dimension=1)
        logits = jnp.where(lane < num_classes, logits, jnp.float32(-1e30))
        m = jnp.max(logits, axis=1, keepdims=True)
        shifted = logits - m
        lse = jnp.log(jnp.sum(jnp.exp(shifted), axis=1, keepdims=True))
        o_ref[...] = shifted - lse


def ffnn_bow_forward(features, w1, b1, w2, b2, *,
                     b_tile=512, v_tile=4096, use_bf16=True, input_buffers=2):
    B, V = features.shape
    Vw, H = w1.shape
    assert Vw == V, (Vw, V)
    Hw, C = w2.shape
    assert Hw == H, (Hw, H)

    compute_dtype = jnp.bfloat16 if use_bf16 else jnp.float32
    itemsize = jnp.dtype(compute_dtype).itemsize
    sub_q = 16 if use_bf16 else 8        # sublane quantum for the streamed dtype

    Cp = _round_up(C, LANE)

    # Batch tile: aim for >= 2 tiles when B is big enough (v7x megacore);
    # otherwise use a single full-extent block (always layout-legal, no pad).
    if B >= 2 * sub_q:
        bt = min(max((b_tile // sub_q) * sub_q, sub_q),
                 _round_up(-(-B // 2), sub_q))
    else:
        bt = B
    Bp = _round_up(B, bt)

    # Vocab tile: prefer an exact divisor of V so x / w1 need no padded copy.
    vt = _pick_vocab_tile(V, v_tile)
    Vp = _round_up(V, vt)

    # Stream the two large operands in the (narrow) compute dtype; only
    # materialize a padded copy when the tile choice actually requires it.
    x_c = features.astype(compute_dtype)
    w1_c = w1.astype(compute_dtype)
    if Bp != B or Vp != V:
        x_c = jnp.pad(x_c, ((0, Bp - B), (0, Vp - V)))
    if Vp != V:
        w1_c = jnp.pad(w1_c, ((0, Vp - V), (0, 0)))

    # Tiny resident operands stay f32; only the class dim is lane-padded.
    b1_r = jnp.reshape(b1, (1, H)).astype(jnp.float32)
    w2_p = jnp.pad(w2.astype(jnp.float32), ((0, 0), (0, Cp - C)))
    b2_p = jnp.pad(jnp.reshape(b2, (1, C)).astype(jnp.float32),
                   ((0, 0), (0, Cp - C)))

    grid = (Bp // bt, Vp // vt)
    kernel = functools.partial(ffnn_bow_kernel, num_classes=C)

    # Optional deeper pipelining on the streamed inputs (e.g. Buffered(3) on
    # v5e); the default 2 keeps standard double-buffering.
    stream_kwargs = {}
    if input_buffers > 2:
        stream_kwargs = dict(pipeline_mode=pl.Buffered(input_buffers))

    # VMEM limit sized from the actual footprint (portable to v7x's 64 MiB VMEM).
    n_buf = max(2, input_buffers)
    footprint = (n_buf * (bt * vt + vt * H) * itemsize     # streamed x / w1
                 + 2 * bt * Cp * 4                         # output double-buffer
                 + bt * H * 4                              # accumulator scratch
                 + (H * Cp + Cp + H) * 4)                  # resident b1/w2/b2
    vmem_limit = int(min(64 * 1024 * 1024,
                         max(8 * 1024 * 1024, 2 * footprint)))

    # Advisory cost estimate so XLA can schedule neighbors around the call.
    n_btiles = Bp // bt
    cost = pl.CostEstimate(
        flops=2 * Bp * Vp * H + 2 * Bp * H * Cp,
        transcendentals=Bp * (H + Cp),
        bytes_accessed=(Bp * Vp * itemsize                 # x stream
                        + n_btiles * Vp * H * itemsize     # w1 per batch tile
                        + Bp * Cp * 4                      # output
                        + (H * Cp + Cp + H) * 4),          # resident operands
    )

    out_padded = pl.pallas_call(
        kernel,
        out_shape=jax.ShapeDtypeStruct((Bp, Cp), jnp.float32),
        grid_spec=pltpu.PrefetchScalarGridSpec(
            num_scalar_prefetch=0,
            grid=grid,
            in_specs=[
                pl.BlockSpec((bt, vt), lambda i, k: (i, k), **stream_kwargs),  # x
                pl.BlockSpec((vt, H), lambda i, k: (k, 0), **stream_kwargs),   # w1 (unpadded H)
                pl.BlockSpec((1, H), lambda i, k: (0, 0)),    # b1 (resident)
                pl.BlockSpec((H, Cp), lambda i, k: (0, 0)),   # w2 (resident)
                pl.BlockSpec((1, Cp), lambda i, k: (0, 0)),   # b2 (resident)
            ],
            out_specs=pl.BlockSpec((bt, Cp), lambda i, k: (i, 0)),
            scratch_shapes=[pltpu.VMEM((bt, H), jnp.float32)],
        ),
        compiler_params=pltpu.CompilerParams(
            dimension_semantics=("parallel", "arbitrary"),
            vmem_limit_bytes=vmem_limit,
        ),
        cost_estimate=cost,
    )(x_c, w1_c, b1_r, w2_p, b2_p)

    return out_padded[:B, :C]


def init_params(key, vocab_size, num_classes, hidden_layer_size=8, initrange=0.5):
    # PyTorch: weight.uniform_(-0.5, 0.5), bias.zero_().  Weights stored
    # transposed ([in, out]) for the kernel's x @ W convention.
    k1, k2 = jax.random.split(key)
    w1 = jax.random.uniform(k1, (vocab_size, hidden_layer_size),
                            minval=-initrange, maxval=initrange, dtype=jnp.float32)
    b1 = jnp.zeros((hidden_layer_size,), jnp.float32)
    w2 = jax.random.uniform(k2, (hidden_layer_size, num_classes),
                            minval=-initrange, maxval=initrange, dtype=jnp.float32)
    b2 = jnp.zeros((num_classes,), jnp.float32)
    return w1, b1, w2, b2


if __name__ == "__main__":
    key = jax.random.PRNGKey(0)
    k_param, k_feat = jax.random.split(key)

    batch = 8
    vocab_size = 256
    hidden_layer_size = 8   # module default
    num_classes = 4

    w1, b1, w2, b2 = init_params(k_param, vocab_size, num_classes, hidden_layer_size)
    # Bag-of-words style features, [B, V] float32.
    # Note: bf16 streaming quantizes counts > 256; use use_bf16=False if exact
    # large-integer counts matter.
    features = jax.random.uniform(k_feat, (batch, vocab_size), dtype=jnp.float32)

    fwd_bf16 = jax.jit(ffnn_bow_forward)                                   # bf16 streaming path
    fwd_f32 = jax.jit(functools.partial(ffnn_bow_forward, use_bf16=False))  # f32 path

    out = fwd_bf16(features, w1, b1, w2, b2)
    out_f32 = fwd_f32(features, w1, b1, w2, b2)
    jax.block_until_ready((out, out_f32))
    assert out.shape == (batch, num_classes)
    assert out_f32.shape == (batch, num_classes)

    hp = jax.lax.Precision.HIGHEST
    # f32 kernel path vs. pure-f32 reference of the PyTorch forward.
    ref_f32 = jax.nn.log_softmax(
        jnp.tanh(jnp.dot(features, w1, precision=hp) + b1) @ w2 + b2, axis=1)
    assert jnp.allclose(out_f32, ref_f32, atol=5e-2, rtol=5e-2), \
        float(jnp.max(jnp.abs(out_f32 - ref_f32)))
    # bf16 kernel path vs. a reference mirroring its arithmetic (bf16 products,
    # f32 accumulation on the first matmul).
    h_pre = jnp.dot(features.astype(jnp.bfloat16), w1.astype(jnp.bfloat16),
                    preferred_element_type=jnp.float32, precision=hp)
    ref_bf16 = jax.nn.log_softmax(jnp.tanh(h_pre + b1) @ w2 + b2, axis=1)
    assert jnp.allclose(out, ref_bf16, atol=2e-2, rtol=2e-2), \
        float(jnp.max(jnp.abs(out - ref_bf16)))

    print("KERNEL_OK")
</pallas_src>

<mosaic_0001>
module attributes {stable_mosaic.version = 11 : i64} {
  func.func @ffnn_bow_kernel(%arg0: i32, %arg1: i32, %arg2: memref<8x256xbf16, #tpu.memory_space<vmem>>, %arg3: memref<256x8xbf16, #tpu.memory_space<vmem>>, %arg4: memref<1x8xf32, #tpu.memory_space<vmem>>, %arg5: memref<8x128xf32, #tpu.memory_space<vmem>>, %arg6: memref<1x128xf32, #tpu.memory_space<vmem>>, %arg7: memref<8x128xf32, #tpu.memory_space<vmem>>, %arg8: memref<8x8xf32, #tpu.memory_space<vmem>>) attributes {dimension_semantics = [#tpu.dimension_semantics<parallel>, #tpu.dimension_semantics<arbitrary>], iteration_bounds = array<i64: 1, 1>, scalar_prefetch = 0 : i64, scratch_operands = 1 : i64, tpu.core_type = #tpu.core_type<tc>, window_params = [{transform_indices = @transform_0, window_bounds = array<i64: 8, 256>}, {transform_indices = @transform_1, window_bounds = array<i64: 256, 8>}, {pipeline_mode = #tpu.pipeline_mode<synchronous>, transform_indices = @transform_2, window_bounds = array<i64: 1, 8>}, {pipeline_mode = #tpu.pipeline_mode<synchronous>, transform_indices = @transform_3, window_bounds = array<i64: 8, 128>}, {pipeline_mode = #tpu.pipeline_mode<synchronous>, transform_indices = @transform_4, window_bounds = array<i64: 1, 128>}, {transform_indices = @transform_5, window_bounds = array<i64: 8, 128>}]} {
    %c0_i32 = arith.constant 0 : i32
    %0 = arith.cmpi eq, %arg1, %c0_i32 : i32
    %1 = arith.extui %0 : i1 to i32
    %c0_i32_0 = arith.constant 0 : i32
    %2 = arith.cmpi ne, %1, %c0_i32_0 : i32
    scf.if %2 {
      %cst_10 = arith.constant 0.000000e+00 : f32
      %12 = vector.broadcast %cst_10 : f32 to vector<8x8xf32>
      %c0_11 = arith.constant 0 : index
      %c0_12 = arith.constant 0 : index
      %13 = vector.load %arg8[%c0_11, %c0_12] : memref<8x8xf32, #tpu.memory_space<vmem>>, vector<8x8xf32>
      tpu.vector_store %arg8[%c0_11, %c0_12], %12 {strides = array<i32>} : memref<8x8xf32, #tpu.memory_space<vmem>>, vector<8x8xf32>,
    } else {
    }
    %c0 = arith.constant 0 : index
    %c0_1 = arith.constant 0 : index
    %3 = vector.load %arg8[%c0, %c0_1] : memref<8x8xf32, #tpu.memory_space<vmem>>, vector<8x8xf32>
    %c0_2 = arith.constant 0 : index
    %c0_3 = arith.constant 0 : index
    %4 = vector.load %arg2[%c0_2, %c0_3] : memref<8x256xbf16, #tpu.memory_space<vmem>>, vector<8x256xbf16>
    %c0_4 = arith.constant 0 : index
    %c0_5 = arith.constant 0 : index
    %5 = vector.load %arg3[%c0_4, %c0_5] : memref<256x8xbf16, #tpu.memory_space<vmem>>, vector<256x8xbf16>
    %cst = arith.constant dense<0.000000e+00> : vector<8x8xf32>
    %6 = tpu.matmul %4, %5, %cst {dimension_numbers = #tpu.dot_dimension_numbers<[1], [0], [0], [1], [0, 0, 1, 1], [], []>} : vector<8x256xbf16>, vector<256x8xbf16>, vector<8x8xf32> -> vector<8x8xf32>
    %7 = arith.addf %3, %6 : vector<8x8xf32>
    %c0_6 = arith.constant 0 : index
    %c0_7 = arith.constant 0 : index
    %8 = vector.load %arg8[%c0_6, %c0_7] : memref<8x8xf32, #tpu.memory_space<vmem>>, vector<8x8xf32>
    tpu.vector_store %arg8[%c0_6, %c0_7], %7 {strides = array<i32>} : memref<8x8xf32, #tpu.memory_space<vmem>>, vector<8x8xf32>,
    %c0_i32_8 = arith.constant 0 : i32
    %9 = arith.cmpi eq, %arg1, %c0_i32_8 : i32
    %10 = arith.extui %9 : i1 to i32
    %c0_i32_9 = arith.constant 0 : i32
    %11 = arith.cmpi ne, %10, %c0_i32_9 : i32
    scf.if %11 {
      %c0_10 = arith.constant 0 : index
      %c0_11 = arith.constant 0 : index
      %12 = vector.load %arg8[%c0_10, %c0_11] : memref<8x8xf32, #tpu.memory_space<vmem>>, vector<8x8xf32>
      %c0_12 = arith.constant 0 : index
      %c0_13 = arith.constant 0 : index
      %13 = vector.load %arg4[%c0_12, %c0_13] : memref<1x8xf32, #tpu.memory_space<vmem>>, vector<1x8xf32>
      %14 = vector.broadcast %13 : vector<1x8xf32> to vector<8x8xf32>
      %15 = arith.addf %12, %14 : vector<8x8xf32>
      %16 = math.tanh %15 : vector<8x8xf32>
      %c0_14 = arith.constant 0 : index
      %c0_15 = arith.constant 0 : index
      %17 = vector.load %arg5[%c0_14, %c0_15] : memref<8x128xf32, #tpu.memory_space<vmem>>, vector<8x128xf32>
      %cst_16 = arith.constant dense<0.000000e+00> : vector<8x128xf32>
      %18 = tpu.matmul %16, %17, %cst_16 {dimension_numbers = #tpu.dot_dimension_numbers<[1], [0], [0], [1], [0, 0, 1, 1], [], []>} : vector<8x8xf32>, vector<8x128xf32>, vector<8x128xf32> -> vector<8x128xf32>
      %c0_17 = arith.constant 0 : index
      %c0_18 = arith.constant 0 : index
      %19 = vector.load %arg6[%c0_17, %c0_18] : memref<1x128xf32, #tpu.memory_space<vmem>>, vector<1x128xf32>
      %20 = vector.broadcast %19 : vector<1x128xf32> to vector<8x128xf32>
      %21 = arith.addf %18, %20 : vector<8x128xf32>
      %22 = tpu.iota {dimensions = array<i32: 1>} : vector<8x128xi32>
      %c4_i32 = arith.constant 4 : i32
      %23 = vector.broadcast %c4_i32 : i32 to vector<8x128xi32>
      %24 = arith.cmpi slt, %22, %23 : vector<8x128xi32>
      %cst_19 = arith.constant -1.000000e+30 : f32
      %25 = vector.broadcast %cst_19 : f32 to vector<8x128xf32>
      %26 = arith.select %24, %21, %25 : vector<8x128xi1>, vector<8x128xf32>
      %cst_20 = arith.constant dense<0xFF800000> : vector<8xf32>
      %27 = vector.multi_reduction <maximumf>, %26, %cst_20 [1] : vector<8x128xf32> to vector<8xf32>
      %28 = vector.shape_cast %27 : vector<8xf32> to vector<8x1xf32>
      %29 = vector.broadcast %28 : vector<8x1xf32> to vector<8x128xf32>
      %30 = arith.subf %26, %29 : vector<8x128xf32>
      %31 = math.exp %30 : vector<8x128xf32>
      %cst_21 = arith.constant dense<0.000000e+00> : vector<8xf32>
      %32 = vector.multi_reduction <add>, %31, %cst_21 [1] : vector<8x128xf32> to vector<8xf32>
      %33 = vector.shape_cast %32 : vector<8xf32> to vector<8x1xf32>
      %34 = math.log %33 : vector<8x1xf32>
      %35 = vector.broadcast %34 : vector<8x1xf32> to vector<8x128xf32>
      %36 = arith.subf %30, %35 : vector<8x128xf32>
      %c0_22 = arith.constant 0 : index
      %c0_23 = arith.constant 0 : index
      %37 = vector.load %arg7[%c0_22, %c0_23] : memref<8x128xf32, #tpu.memory_space<vmem>>, vector<8x128xf32>
      tpu.vector_store %arg7[%c0_22, %c0_23], %36 {strides = array<i32>} : memref<8x128xf32, #tpu.memory_space<vmem>>, vector<8x128xf32>,
    } else {
    }
    return
  }
  func.func @transform_0(%arg0: i32, %arg1: i32) -> (i32, i32) {
    %c0_i32 = arith.constant 0 : i32
    return %arg0, %arg1 : i32, i32
  }
  func.func @transform_1(%arg0: i32, %arg1: i32) -> (i32, i32) {
    %c0_i32 = arith.constant 0 : i32
    %c0_i32_0 = arith.constant 0 : i32
    return %arg1, %c0_i32 : i32, i32
  }
  func.func @transform_2(%arg0: i32, %arg1: i32) -> (i32, i32) {
    %c0_i32 = arith.constant 0 : i32
    %c0_i32_0 = arith.constant 0 : i32
    %c0_i32_1 = arith.constant 0 : i32
    return %c0_i32, %c0_i32_0 : i32, i32
  }
  func.func @transform_3(%arg0: i32, %arg1: i32) -> (i32, i32) {
    %c0_i32 = arith.constant 0 : i32
    %c0_i32_0 = arith.constant 0 : i32
    %c0_i32_1 = arith.constant 0 : i32
    return %c0_i32, %c0_i32_0 : i32, i32
  }
  func.func @transform_4(%arg0: i32, %arg1: i32) -> (i32, i32) {
    %c0_i32 = arith.constant 0 : i32
    %c0_i32_0 = arith.constant 0 : i32
    %c0_i32_1 = arith.constant 0 : i32
    return %c0_i32, %c0_i32_0 : i32, i32
  }
  func.func @transform_5(%arg0: i32, %arg1: i32) -> (i32, i32) {
    %c0_i32 = arith.constant 0 : i32
    %c0_i32_0 = arith.constant 0 : i32
    return %arg0, %c0_i32 : i32, i32
  }
}

</mosaic_0001>

<bundles_post_ra>
// kernel: ffnn_bow_forward.1
= control target key start
LH: loop header
LB: loop body
LE: loop exit
PB: predicated region body
PF: predicated region fallthrough
CT: control target
= control target key end

     0   :  { %vm25_vm0 = vcmask 64512   ;;  %v396_v19 = vmov 0.0   ;;  %vm397_vm1 = vmmov 0   ;;  %v301_v32 = vlaneseq  ;;  %s494_s1 = inlined_call_operand.vmem [shape: bf16[256,8], index: 1, kind: input, shape index: {}]   ;;  %s495_s0 = inlined_call_operand.vmem [shape: bf16[8,256], index: 0, kind: input, shape index: {}]   ;;  %s496_s3 = inlined_call_operand.vmem [shape: f32[8,128], index: 3, kind: input, shape index: {}]   ;;  %s497_s2 = inlined_call_operand.vmem [shape: f32[1,8], index: 2, kind: input, shape index: {}]   ;;  %s498_s4 = inlined_call_operand.vmem [shape: f32[1,128], index: 4, kind: input, shape index: {}]   ;;  %s499_s5 = inlined_call_operand.vmem [shape: f32[8,128], index: 5, kind: output, shape index: {}]  }
   0x1   :  { %v372_v0 = vld [vmem:[%s494_s1 + $0x78] sm:$0xff]   ;;  %v374_v2 = vld [vmem:[%s494_s1 + $0x70] sm:$0xff]   ;;  %v376_v4 = vld [vmem:[%s494_s1 + $0x68] sm:$0xff]   ;;  %26 = vst.msk [vmem:[#allocation2] sm:$0xff] %vm25_vm0, %v396_v19  ;;  %365 = vmatprep.subr.mxu1 %v396_v19  ;;  %367 = vmatprep.mubr.msk.f32.mxu1 %vm397_vm1, %v396_v19 }
   0x2   :  { %v373_v1 = vld [vmem:[%s494_s1 + $0x38] sm:$0xff]   ;;  %341 = vmatprep.subr.bf16.mxu0 %v372_v0  ;;  %v375_v3 = vld [vmem:[%s494_s1 + $0x30] sm:$0xff]   ;;  %v377_v5 = vld [vmem:[%s494_s1 + $0x28] sm:$0xff]   ;;  %v302_v33 = vand.u32 127, %v301_v32 }
   0x3   :  { %342 = vmatpush3.bf16.msra.mxu0 %v373_v1  ;;  %v378_v6 = vld [vmem:[%s494_s1 + $0x60] sm:$0xff]   ;;  %v380_v8 = vld [vmem:[%s494_s1 + $0x58] sm:$0xff]   ;;  %v382_v10 = vld [vmem:[%s494_s1 + $0x50] sm:$0xff]  }
   0x4   :  { %343 = vmatprep.subr.bf16.mxu0 %v374_v2  ;;  %v379_v7 = vld [vmem:[%s494_s1 + $0x20] sm:$0xff]   ;;  %v381_v9 = vld [vmem:[%s494_s1 + $0x18] sm:$0xff]   ;;  %v383_v13 = vld [vmem:[%s494_s1 + $0x10] sm:$0xff]   ;;  %vm303_vm2 = vcmp.lt.s32.totalorder %v302_v33, 4 }
   0x5   :  { %v28_v11 = vld [vmem:[%s495_s0] sm:$0xff]  ;;  %v384_v14 = vld [vmem:[%s494_s1 + $0x48] sm:$0xff]  }
   0x6   :  { %v321_v12 = vcombine.high %v28_v11, %v28_v11  ;;  %v385_v15 = vld [vmem:[%s494_s1 + $0x8] sm:$0xff]   ;;  %v386_v16 = vld [vmem:[%s494_s1 + $0x40] sm:$0xff]   ;;  %v320_v18 = vcombine.low %v28_v11, %v28_v11 }
   0x7   :  { %344 = vmatpush3.bf16.msra.mxu0 %v375_v3  ;;  %v387_v17 = vld [vmem:[%s494_s1] sm:$0xff]  }
   0x8   :  { %345 = vmatprep.subr.bf16.mxu0 %v376_v4  ;;  %196 = vmatprep.mubr.bf16.mxu0 %v321_v12  ;;  %v220_v20 = vld [vmem:[%s496_s3] sm:$0xff] }
   0x9   :  { %366 = vmatpush3.msra.mxu1 %v220_v20  ;;  %v27_v23 = vld [vmem:[#allocation2] sm:$0xff] }
   0xa   :  { %v338_v28 = vld [vmem:[%s497_s2] ss:$0 sm:$0xff] }
   0xb   :  { %346 = vmatpush3.bf16.msra.mxu0 %v377_v5  ;;  %v339_v34 = vld [vmem:[%s498_s4] ss:$0 sm:$0xff] }
   0xc   :  { %347 = vmatprep.subr.bf16.mxu0 %v378_v6 }
   0xf   :  { %348 = vmatpush3.bf16.msra.mxu0 %v379_v7 }
  0x10   :  { %349 = vmatprep.subr.bf16.mxu0 %v380_v8 }
  0x13   :  { %350 = vmatpush3.bf16.msra.mxu0 %v381_v9 }
  0x14   :  { %351 = vmatprep.subr.bf16.mxu0 %v382_v10 }
  0x17   :  { %352 = vmatpush3.bf16.msra.mxu0 %v383_v13 }
  0x18   :  { %353 = vmatprep.subr.bf16.mxu0 %v384_v14 }
  0x1b   :  { %354 = vmatpush3.bf16.msra.mxu0 %v385_v15 }
  0x1c   :  { %355 = vmatprep.subr.bf16.mxu0 %v386_v16 }
  0x1f   :  { %356 = vmatpush3.bf16.msra.mxu0 %v387_v17 }
  0x22   :  { %197 = vmatmul.mubr.bf16.vlgmr.msra.gmra.mxu0 %v320_v18 }
  0xe2   :  { %v357_v21 = vpop.f32.mrf.mxu0 }
  0xe4   :  { %v358_v22 = vpop.f32.mrf.mxu0 }
  0xe5   :  { %v359_v24 = vadd.f32 %v358_v22, %v357_v21 }
  0xe6   :  { %v360_v25 = vpop.f32.mrf.mxu0 }
  0xe7   :  { %v204_v26 = vadd.f32 %v359_v24, %v27_v23 }
  0xe8   :  { %v361_v27 = vpop.f32.mrf.mxu0 }
  0xe9   :  { %206 = vst.msk [vmem:[#allocation2] sm:$0xff] %vm25_vm0, %v204_v26 }
  0xf0   :  { %v210_v29 = vld [vmem:[#allocation2] sm:$0xff] }
  0xf1   :  { %v218_v30 = vadd.f32 %v338_v28, %v210_v29 }
  0xf3   :  { %390 = vtanh.f32 %v218_v30 }
 0x100   :  { %v391_v31 = vpop.eup %390 }
 0x101   :  { %368 = vmatmul.mubr.msk.f32.vlgmr.msra.gmra.mxu1 %vm25_vm0, %v391_v31 }
 0x1c1   :  { %v297_v35 = vpop.f32.mrf.mxu1 }
 0x1c2   :  { %v298_v36 = vadd.f32 %v339_v34, %v297_v35 }
 0x1c3   :  { %v369_v37 = vpop.f32.mrf.mxu1 }
 0x1c4   :  { %v304_v38 = vsel %vm303_vm2, %v298_v36, -1e+30 }
 0x1c5   :  { %305 = vmax.xlane.f32.xlu0 %v304_v38 }
 0x24e   :  { %v306_v39 = vpop.xlane.xlu0 %305 }
 0x24f   :  { %v307_v40 = vsub.f32 %v304_v38, %v306_v39 }
 0x251   :  { %v308_v41 = vmul.f32 1.442695, %v307_v40 }
 0x253   :  { %392 = vpow2.f32 %v308_v41 }
 0x260   :  { %v393_v42 = vpop.eup %392 }
 0x261   :  { %310 = vadd.xlane.f32.xlu0 %v393_v42 }
 0x2ea   :  { %v311_v43 = vpop.xlane.xlu0 %310 }
 0x2eb   :  { %394 = vlog2.f32 %v311_v43 }
 0x2f8   :  { %v395_v44 = vpop.eup %394 }
 0x2f9   :  { %v313_v45 = vmul.f32 0.6931472, %v395_v44 }
 0x2fb   :  { %v314_v46 = vsub.f32 %v307_v40, %v313_v45 }
 0x2fd   :  { %315 = vst [vmem:[%s499_s5] sm:$0xff] %v314_v46 }

</bundles_post_ra>
